<compile_context>
chip_gen: v7x
topology: tpu7x:2x2x1
jax: 0.10.0
libtpu: 0.0.40
codegen_flags: <defaults>
</compile_context>

<pallas_src>
import functools

import jax
import jax.numpy as jnp
from jax.experimental import pallas as pl
from jax.experimental.pallas import tpu as pltpu


def _round_up(v, m):
    return ((v + m - 1) // m) * m


def _physical_vmem_bytes():
    try:
        info = pltpu.get_tpu_info()
        cap = getattr(info, "vmem_capacity_bytes", None)
        if cap:
            return int(cap)
    except Exception:
        pass
    return 64 * 1024 * 1024  # conservative: v7x per-TensorCore VMEM


def _pick_node_tile(N, B, node_tile):
    """Padded node dim Np (multiple of 128) and tile T (multiple of 128, divides Np)."""
    Np = _round_up(N, 128)
    units = Np // 128
    cap = max(node_tile // 128, 1)
    if B == 1 and units >= 2:
        # Keep >= 2 node tiles so the parallel (b, i) axes can still shard
        # across the two TensorCores of a v7x chip at batch 1.
        cap = min(cap, units // 2)
    best = 1
    for d in range(1, units + 1):
        if units % d == 0 and d <= cap:
            best = d
    return Np, best * 128


def _tile_contribution(adj_ref, z_ref, *, T, z_resident, compute_dtype):
    k = pl.program_id(2)
    # adj arrives in its native (typically f32) dtype; cast on-chip (VPU, hidden
    # under the tile DMA) immediately before the MXU dot.
    adj_blk = adj_ref[...].astype(compute_dtype)
    if z_resident:
        start = pl.multiple_of(k * T, T)
        z_blk = z_ref[pl.ds(start, T), :]
    else:
        z_blk = z_ref[...]
    return jnp.dot(adj_blk, z_blk, preferred_element_type=jnp.float32)


def _graphconv_kernel_no_w(adj_ref, z_ref, b_ref, o_ref, acc_ref,
                           *, T, z_resident, compute_dtype):
    # Weight was pre-applied to the streamed operand (D_out <= D_in case).
    k = pl.program_id(2)
    contrib = _tile_contribution(adj_ref, z_ref, T=T, z_resident=z_resident,
                                 compute_dtype=compute_dtype)

    @pl.when(k == 0)
    def _():
        acc_ref[...] = contrib

    @pl.when(k > 0)
    def _():
        acc_ref[...] += contrib

    @pl.when(k == pl.num_programs(2) - 1)
    def _():
        o_ref[...] = (acc_ref[...] + b_ref[...]).astype(o_ref.dtype)


def _graphconv_kernel_with_w(adj_ref, z_ref, w_ref, b_ref, o_ref, acc_ref,
                             *, T, z_resident, compute_dtype):
    # Weight applied in the finalize step (D_out > D_in case), bf16 MXU dot.
    k = pl.program_id(2)
    contrib = _tile_contribution(adj_ref, z_ref, T=T, z_resident=z_resident,
                                 compute_dtype=compute_dtype)

    @pl.when(k == 0)
    def _():
        acc_ref[...] = contrib

    @pl.when(k > 0)
    def _():
        acc_ref[...] += contrib

    @pl.when(k == pl.num_programs(2) - 1)
    def _():
        y = jnp.dot(acc_ref[...].astype(compute_dtype), w_ref[...],
                    preferred_element_type=jnp.float32)
        o_ref[...] = (y + b_ref[...]).astype(o_ref.dtype)


def graph_conv(x, adj, weight, bias, *, compute_dtype=jnp.bfloat16, node_tile=1024):
    """x: [B, N, D_in], adj: [B, N, N], weight: [D_in, D_out], bias: [D_out]."""
    B, N, D_in = x.shape
    D_out = weight.shape[1]
    out_dtype = x.dtype

    # --- static matmul-order choice: stream the smaller feature dim ----------
    apply_weight_in_kernel = D_out > D_in
    if apply_weight_in_kernel:
        z = x.astype(compute_dtype)                                  # stream x
    else:
        # Pre-apply W once (B*N*D_in*D_out flops << B*N^2*D_out).
        z = jnp.matmul(x, weight,
                       preferred_element_type=jnp.float32).astype(compute_dtype)
    Dz = z.shape[-1]

    # --- tiling / padding (features padded to 128 for lane-dense stores) -----
    Dz_pad = _round_up(Dz, 128)
    Do_pad = _round_up(D_out, 128)
    Np, T = _pick_node_tile(N, B, node_tile)

    # adj stays in its native dtype; only pad (zeros) if N is not a 128-multiple.
    adj_p = adj
    if Np != N:
        adj_p = jnp.pad(adj_p, ((0, 0), (0, Np - N), (0, Np - N)))

    z_p = z
    if Np != N:
        z_p = jnp.pad(z_p, ((0, 0), (0, Np - N), (0, 0)))
    if Dz_pad != Dz:
        z_p = jnp.pad(z_p, ((0, 0), (0, 0), (0, Dz_pad - Dz)))

    bias_p = bias.astype(jnp.float32)
    if Do_pad != D_out:
        bias_p = jnp.pad(bias_p, ((0, Do_pad - D_out),))
    bias2d = bias_p.reshape(1, Do_pad)

    # --- VMEM budget (per-generation) -----------------------------------------
    phys_vmem = _physical_vmem_bytes()
    z_item = jnp.dtype(compute_dtype).itemsize
    adj_item = jnp.dtype(adj_p.dtype).itemsize
    out_item = jnp.dtype(out_dtype).itemsize

    resident_z_bytes = 2 * Np * Dz_pad * z_item          # double-buffered panel
    z_resident = resident_z_bytes <= phys_vmem // 4

    footprint = (
        2 * T * T * adj_item                                           # adj tiles
        + (resident_z_bytes if z_resident else 2 * T * Dz_pad * z_item)  # z
        + 2 * T * Do_pad * out_item                                    # out tiles
        + T * Dz_pad * 4                                               # f32 acc
        + 2 * Do_pad * 4                                               # bias
    )

    grid = (B, Np // T, Np // T)
    adj_spec = pl.BlockSpec((None, T, T), lambda b, i, k: (b, i, k))
    if z_resident:
        z_spec = pl.BlockSpec((None, Np, Dz_pad), lambda b, i, k: (b, 0, 0))
    else:
        z_spec = pl.BlockSpec((None, T, Dz_pad), lambda b, i, k: (b, k, 0))
    bias_spec = pl.BlockSpec((1, Do_pad), lambda b, i, k: (0, 0))
    out_spec = pl.BlockSpec((None, T, Do_pad), lambda b, i, k: (b, i, 0))

    kernel_kwargs = dict(T=T, z_resident=z_resident, compute_dtype=compute_dtype)
    if apply_weight_in_kernel:
        w_p = weight.astype(compute_dtype)                 # bf16 finalize weight
        if Dz_pad != D_in:
            w_p = jnp.pad(w_p, ((0, Dz_pad - D_in), (0, 0)))
        if Do_pad != D_out:
            w_p = jnp.pad(w_p, ((0, 0), (0, Do_pad - D_out)))
        footprint += 2 * Dz_pad * Do_pad * jnp.dtype(compute_dtype).itemsize
        kernel = functools.partial(_graphconv_kernel_with_w, **kernel_kwargs)
        in_specs = [adj_spec, z_spec,
                    pl.BlockSpec((Dz_pad, Do_pad), lambda b, i, k: (0, 0)),
                    bias_spec]
        args = (adj_p, z_p, w_p, bias2d)
    else:
        kernel = functools.partial(_graphconv_kernel_no_w, **kernel_kwargs)
        in_specs = [adj_spec, z_spec, bias_spec]
        args = (adj_p, z_p, bias2d)

    vmem_limit = min(max(int(footprint * 1.5), 16 * 1024 * 1024), phys_vmem)

    out = pl.pallas_call(
        kernel,
        out_shape=jax.ShapeDtypeStruct((B, Np, Do_pad), out_dtype),
        grid_spec=pltpu.PrefetchScalarGridSpec(
            num_scalar_prefetch=0,
            grid=grid,
            in_specs=in_specs,
            out_specs=out_spec,
            scratch_shapes=[pltpu.VMEM((T, Dz_pad), jnp.float32)],
        ),
        compiler_params=pltpu.CompilerParams(
            dimension_semantics=("parallel", "parallel", "arbitrary"),
            vmem_limit_bytes=vmem_limit,
        ),
    )(*args)

    return out[:, :N, :D_out]


def _reference_f32(x, adj, weight, bias):
    y = jnp.matmul(adj, x)
    y = jnp.matmul(y, weight) + bias
    return y


def _check(x, adj, weight, bias, node_tile=1024):
    out = jax.block_until_ready(graph_conv(x, adj, weight, bias, node_tile=node_tile))
    ref = _reference_f32(x, adj, weight, bias)
    assert out.shape == ref.shape, (out.shape, ref.shape)
    err = float(jnp.max(jnp.abs(out.astype(jnp.float32) - ref)))
    scale = float(jnp.max(jnp.abs(ref))) + 1e-6
    # bf16-streamed operands -> loosened relative-to-max tolerance.
    assert err / scale < 3e-2, f"rel err {err / scale}"


if __name__ == "__main__":
    key = jax.random.PRNGKey(0)

    # Case 1: D_out < D_in -> weight pre-applied; N=200 exercises node padding.
    B, N, D_in, D_out = 2, 200, 64, 32
    k1, k2, k3, k4, key = jax.random.split(key, 5)
    x = jax.random.normal(k1, (B, N, D_in), dtype=jnp.float32)
    adj = jax.random.normal(k2, (B, N, N), dtype=jnp.float32)
    weight = jax.random.normal(k3, (D_in, D_out), dtype=jnp.float32) * 0.1
    bias = jax.random.normal(k4, (D_out,), dtype=jnp.float32) * 0.1
    _check(x, adj, weight, bias)

    # Case 2: D_out > D_in -> weight applied in the kernel finalize step.
    B, N, D_in, D_out = 1, 128, 32, 64
    k1, k2, k3, k4, key = jax.random.split(key, 5)
    x = jax.random.normal(k1, (B, N, D_in), dtype=jnp.float32)
    adj = jax.random.normal(k2, (B, N, N), dtype=jnp.float32)
    weight = jax.random.normal(k3, (D_in, D_out), dtype=jnp.float32) * 0.1
    bias = jax.random.normal(k4, (D_out,), dtype=jnp.float32) * 0.1
    _check(x, adj, weight, bias)

    # Case 3: B=1 with multiple node tiles -> multi-step k accumulation,
    # resident-z in-kernel slicing, and i-axis splitting for megacore.
    B, N, D_in, D_out = 1, 384, 64, 32
    k1, k2, k3, k4, key = jax.random.split(key, 5)
    x = jax.random.normal(k1, (B, N, D_in), dtype=jnp.float32)
    adj = jax.random.normal(k2, (B, N, N), dtype=jnp.float32)
    weight = jax.random.normal(k3, (D_in, D_out), dtype=jnp.float32) * 0.1
    bias = jax.random.normal(k4, (D_out,), dtype=jnp.float32) * 0.1
    _check(x, adj, weight, bias)

    print("KERNEL_OK")
</pallas_src>

<mosaic_0001>
module attributes {stable_mosaic.version = 11 : i64} {
  func.func @_graphconv_kernel_no_w(%arg0: i32, %arg1: i32, %arg2: i32, %arg3: memref<1x256x256xf32, #tpu.memory_space<vmem>>, %arg4: memref<1x256x128xbf16, #tpu.memory_space<vmem>>, %arg5: memref<1x128xf32, #tpu.memory_space<vmem>>, %arg6: memref<1x256x128xf32, #tpu.memory_space<vmem>>, %arg7: memref<256x128xf32, #tpu.memory_space<vmem>>) attributes {dimension_semantics = [#tpu.dimension_semantics<parallel>, #tpu.dimension_semantics<parallel>, #tpu.dimension_semantics<arbitrary>], iteration_bounds = array<i64: 2, 1, 1>, scalar_prefetch = 0 : i64, scratch_operands = 1 : i64, tpu.core_type = #tpu.core_type<tc>, window_params = [{transform_indices = @transform_0, window_bounds = array<i64: 1, 256, 256>}, {transform_indices = @transform_1, window_bounds = array<i64: 1, 256, 128>}, {pipeline_mode = #tpu.pipeline_mode<synchronous>, transform_indices = @transform_2, window_bounds = array<i64: 1, 128>}, {transform_indices = @transform_3, window_bounds = array<i64: 1, 256, 128>}]} {
    %c0 = arith.constant 0 : index
    %c0_0 = arith.constant 0 : index
    %c0_1 = arith.constant 0 : index
    %0 = vector.load %arg3[%c0, %c0_0, %c0_1] : memref<1x256x256xf32, #tpu.memory_space<vmem>>, vector<1x256x256xf32>
    %1 = vector.shape_cast %0 : vector<1x256x256xf32> to vector<256x256xf32>
    %2 = arith.truncf %1 : vector<256x256xf32> to vector<256x256xbf16>
    %c256_i32 = arith.constant 256 : i32
    %3 = arith.muli %arg2, %c256_i32 : i32
    %4 = tpu.assume_multiple %3, 256 : i32
    %c0_2 = arith.constant 0 : index
    %5 = arith.index_cast %4 : i32 to index
    %c0_3 = arith.constant 0 : index
    %6 = vector.load %arg4[%c0_2, %5, %c0_3] : memref<1x256x128xbf16, #tpu.memory_space<vmem>>, vector<1x256x128xbf16>
    %7 = vector.shape_cast %6 : vector<1x256x128xbf16> to vector<256x128xbf16>
    %cst = arith.constant dense<0.000000e+00> : vector<256x128xf32>
    %8 = tpu.matmul %2, %7, %cst {dimension_numbers = #tpu.dot_dimension_numbers<[1], [0], [0], [1], [0, 0, 1, 1], [], []>} : vector<256x256xbf16>, vector<256x128xbf16>, vector<256x128xf32> -> vector<256x128xf32>
    %c0_i32 = arith.constant 0 : i32
    %9 = arith.cmpi eq, %arg2, %c0_i32 : i32
    %10 = arith.extui %9 : i1 to i32
    %c0_i32_4 = arith.constant 0 : i32
    %11 = arith.cmpi ne, %10, %c0_i32_4 : i32
    scf.if %11 {
      %c0_9 = arith.constant 0 : index
      %c0_10 = arith.constant 0 : index
      %18 = vector.load %arg7[%c0_9, %c0_10] : memref<256x128xf32, #tpu.memory_space<vmem>>, vector<256x128xf32>
      tpu.vector_store %arg7[%c0_9, %c0_10], %8 {strides = array<i32>} : memref<256x128xf32, #tpu.memory_space<vmem>>, vector<256x128xf32>,
    } else {
    }
    %c0_i32_5 = arith.constant 0 : i32
    %12 = arith.cmpi sgt, %arg2, %c0_i32_5 : i32
    %13 = arith.extui %12 : i1 to i32
    %c0_i32_6 = arith.constant 0 : i32
    %14 = arith.cmpi ne, %13, %c0_i32_6 : i32
    scf.if %14 {
      %c0_9 = arith.constant 0 : index
      %c0_10 = arith.constant 0 : index
      %18 = vector.load %arg7[%c0_9, %c0_10] : memref<256x128xf32, #tpu.memory_space<vmem>>, vector<256x128xf32>
      %19 = arith.addf %18, %8 : vector<256x128xf32>
      %c0_11 = arith.constant 0 : index
      %c0_12 = arith.constant 0 : index
      %20 = vector.load %arg7[%c0_11, %c0_12] : memref<256x128xf32, #tpu.memory_space<vmem>>, vector<256x128xf32>
      tpu.vector_store %arg7[%c0_11, %c0_12], %19 {strides = array<i32>} : memref<256x128xf32, #tpu.memory_space<vmem>>, vector<256x128xf32>,
    } else {
    }
    %c0_i32_7 = arith.constant 0 : i32
    %15 = arith.cmpi eq, %arg2, %c0_i32_7 : i32
    %16 = arith.extui %15 : i1 to i32
    %c0_i32_8 = arith.constant 0 : i32
    %17 = arith.cmpi ne, %16, %c0_i32_8 : i32
    scf.if %17 {
      %c0_9 = arith.constant 0 : index
      %c0_10 = arith.constant 0 : index
      %18 = vector.load %arg7[%c0_9, %c0_10] : memref<256x128xf32, #tpu.memory_space<vmem>>, vector<256x128xf32>
      %c0_11 = arith.constant 0 : index
      %c0_12 = arith.constant 0 : index
      %19 = vector.load %arg5[%c0_11, %c0_12] : memref<1x128xf32, #tpu.memory_space<vmem>>, vector<1x128xf32>
      %20 = vector.broadcast %19 : vector<1x128xf32> to vector<256x128xf32>
      %21 = arith.addf %18, %20 : vector<256x128xf32>
      %c0_13 = arith.constant 0 : index
      %c0_14 = arith.constant 0 : index
      %c0_15 = arith.constant 0 : index
      %22 = vector.load %arg6[%c0_13, %c0_14, %c0_15] : memref<1x256x128xf32, #tpu.memory_space<vmem>>, vector<1x256x128xf32>
      %23 = vector.shape_cast %22 : vector<1x256x128xf32> to vector<256x128xf32>
      %24 = vector.shape_cast %21 : vector<256x128xf32> to vector<1x256x128xf32>
      tpu.vector_store %arg6[%c0_13, %c0_14, %c0_15], %24 {strides = array<i32>} : memref<1x256x128xf32, #tpu.memory_space<vmem>>, vector<1x256x128xf32>,
    } else {
    }
    return
  }
  func.func @transform_0(%arg0: i32, %arg1: i32, %arg2: i32) -> (i32, i32, i32) {
    %c0_i32 = arith.constant 0 : i32
    return %arg0, %arg1, %arg2 : i32, i32, i32
  }
  func.func @transform_1(%arg0: i32, %arg1: i32, %arg2: i32) -> (i32, i32, i32) {
    %c0_i32 = arith.constant 0 : i32
    %c0_i32_0 = arith.constant 0 : i32
    %c0_i32_1 = arith.constant 0 : i32
    return %arg0, %c0_i32, %c0_i32_0 : i32, i32, i32
  }
  func.func @transform_2(%arg0: i32, %arg1: i32, %arg2: i32) -> (i32, i32) {
    %c0_i32 = arith.constant 0 : i32
    %c0_i32_0 = arith.constant 0 : i32
    %c0_i32_1 = arith.constant 0 : i32
    return %c0_i32, %c0_i32_0 : i32, i32
  }
  func.func @transform_3(%arg0: i32, %arg1: i32, %arg2: i32) -> (i32, i32, i32) {
    %c0_i32 = arith.constant 0 : i32
    %c0_i32_0 = arith.constant 0 : i32
    return %arg0, %arg1, %c0_i32 : i32, i32, i32
  }
}

</mosaic_0001>

<bundles_post_ra>
// kernel: tpu_custom_call.1
= control target key start
LH: loop header
LB: loop body
LE: loop exit
PB: predicated region body
PF: predicated region fallthrough
CT: control target
= control target key end

     0   :  { %8 = vsyncpa [#allocation4], 0  ;;  %s1843_s0 = inlined_call_operand.hbm [shape: f32[2,256,256], index: 0, kind: input, shape index: {}]   ;;  %s1844_s1 = inlined_call_operand.hbm [shape: bf16[2,256,128], index: 1, kind: input, shape index: {}]   ;;  %s1845_s2 = inlined_call_operand.vmem [shape: f32[1,128], index: 2, kind: input, shape index: {}]   ;;  %s1846_s3 = inlined_call_operand.hbm [shape: f32[2,256,128], index: 3, kind: output, shape index: {}]  }
   0x1   :  { %10 = vsyncpa [#allocation4 + $0x1], 0 }
   0x2   :  { %11 = vsyncpa [#allocation7], 0 }
   0x3   :  { %13 = vsyncpa [#allocation7 + $0x1], 0 }
   0x4   :  { %14 = vsyncpa [#allocation5], 0 }
   0x5   :  { %16 = vsyncpa [#allocation5 + $0x1], 0  ;;  %s1461_s12 = smov 0   ;;  %s1463_s13 = smov 0  }
   0x6   :  { %s1465_s14 = smov 0   ;;  %s1467_s15 = smov 0  }
   0x7   :  { %s1469_s16 = smov 0   ;;  %s1471_s17 = smov 0  }
   0x8 LB: > { %s1028_s18 = sadd.s32 4294967295, %s1430_s17   ;;  %s1029_s19 = sadd.s32 4294967294, %s1430_s17   ;;  %s1430_s17 = sphi %s1471_s17, %s22_s17   ;;  %s1426_s16 = sphi %s1469_s16, %s1864_s16   ;;  %s1422_s15 = sphi %s1467_s15, %s1863_s15   ;;  %s1418_s14 = sphi %s1465_s14, %s1862_s14   ;;  %s1414_s13 = sphi %s1463_s13, %s1861_s13   ;;  %s1410_s12 = sphi %s1461_s12, %s1860_s12  }
   0x9   : > { %s41_s20 = sadd.s32 1, %s1426_s16  ;;  %s52_s21 = sadd.s32 1, %s1418_s14 }
   0xa   : > { %p43_p0 = scmp.ge.s32.totalorder %s41_s20, 2  ;;  %p59_p1 = scmp.ne.s32.totalorder %s1418_s14, %s1414_s13 }
   0xb   : > { %p60_p2 = scmp.eq.s32.totalorder %s1430_s17, 0  ;;  %p65_p3 = scmp.ne.s32.totalorder %s1414_s13, %s1410_s12 }
   0xc   : > { %s1866_s20 = smov (%p43_p0, %s41_s20), 0  ;;  %p66_p5 = scmp.eq.s32.totalorder %s1028_s18, 0 }
   0xd   : > { %p1502_p4 = por %p60_p2, %p59_p1  ;;  %s45_s23 = ssub.s32 %s1426_s16, %s1866_s20 }
   0xe   : > { %p138_p6 = scmp.eq.s32.totalorder %s1028_s18, 1  ;;  %p50_p7 = scmp.eq.s32.totalorder %s45_s23, 0 }
   0xf   : > { %p1508_p8 = por %p66_p5, %p65_p3  ;;  %p144_p10 = scmp.eq.s32.totalorder %s1029_s19, 1 }
  0x10   : > { %p1512_p9 = por %p138_p6, %p59_p1  ;;  %p1212_p13 = scmp.lt.s32.totalorder %s1430_s17, 2 }
  0x11   : > { %s1850_s24 = scalar_select %p1508_p8, 1, 0 }
  0x12   : > { %s1851_s25 = scalar_select %p1512_p9, 1, 0 }
  0x13   : > { %s1517_s26 = scalar_select %p50_p7, %s1418_s14, %s52_s21  }
  0x14   : > { %p1519_p11 = por %p144_p10, %p65_p3  ;;  %s1526_s28 = sand.u32 1, %s1418_s14  }
  0x15   : > { %s1032_s29 = sshll.u32 %s1526_s28, 9  ;;  %s1064_s30 = sshll.u32 %s1426_s16, 13 }
  0x16   : > { %s1852_s27 = scalar_select %p1519_p11, 1, 0 }
  0x17   : > { %s1533_s6 = scalar_lea.hbm %s1843_s0, %s1064_s30  ;;  %s171_s7 = scalar_lea.vmem [#allocation3], %s1032_s29 }
  0x18   : > { %s183_s8 = sshll.u32 %s171_s7, 4  ;;  %p1539_p0 = pnand %p1212_p13, %p1502_p4  ;;  %s1535_s8 = int_to_ptr.vmem [resolvable:$true] %s183_s8 }
  0x19   : > { %s168_s10 = scalar_lea.sflag [#allocation4], %s1526_s28  ;;  %s1284_s11 = scalar_lea.hbm %s1533_s6, 8192 }
  0x1a   : > { %p1285_p2 = scmp.ne.s32.totalorder %s1533_s6, %s1284_s11  ;;  %p1286_p3 = pneg %p1539_p0 }
  0x1b   : > { %s1289_s21 = scalar_lea.hbm %s1843_s0, 16384  ;;  %p1290_p4 = scmp.lt.u32.totalorder %s1533_s6, %s1843_s0 }
  0x1c   : > { %p1287_p5 = pnand %p1286_p3, %p1285_p2  ;;  %p1291_p7 = scmp.lt.u32.totalorder %s1289_s21, %s1284_s11 }
  0x1d   : > { %p1293_p13 = scmp.lt.u32.totalorder %s1284_s11, %s1533_s6 }
  0x1e   : > { %p1288_p6 = pneg %p1287_p5  ;;  %p1292_p10 = por %p1291_p7, %p1290_p4 }
  0x20   : > { %p1294_p12 = por %p1293_p13, %p1292_p10 }
  0x22   : > { %p1295_p1 = pnand %p1294_p12, %p1288_p6 }
  0x24   : > { %1298 = shalt.err (!%p1295_p1)
}
  0x25   : > { %s1299_s29 = scalar_lea.vmem %s1535_s8, 8192  ;;  %s1432_s30 = smov [#allocation3]  }
  0x26   : > { %p1300_p2 = scmp.ne.s32.totalorder %s1535_s8, %s1299_s29  ;;  %s1304_s4 = sshll.u32 %s1432_s30, 4  ;;  %s1305_s4 = int_to_ptr.vmem [resolvable:$false] %s1304_s4 }
  0x27   : > { %s1306_s5 = scalar_lea.vmem %s1305_s4, 16384  ;;  %p1307_p9 = scmp.lt.s32.totalorder %s1535_s8, %s1305_s4 }
  0x28   : > { %p1302_p5 = pnand %p1300_p2, %p1286_p3  ;;  %p1308_p4 = scmp.lt.s32.totalorder %s1306_s5, %s1299_s29 }
  0x2a   : > { %p1303_p11 = pneg %p1302_p5  ;;  %p1309_p7 = por %p1308_p4, %p1307_p9 }
  0x2c   : > { %p1310_p10 = pnand %p1309_p7, %p1303_p11 }
  0x2e   : > { %1313 = shalt.err (!%p1310_p10)
}
  0x2f   : > { %s1433_s7 = smov 256   ;;  %s1434_s11 = smov 16  }
  0x30   : > { %1204 = dma.hbm_to_vmem [thread:$0]  (!%p1539_p0), %s1533_s6, 8192, %s1535_s8, %s168_s10, %s1433_s7, %s1433_s7, %s1434_s11  }
  0x31   : > { %p212_p12 = scmp.lt.s32.totalorder %s1430_s17, 3  ;;  %s1035_s18 = sshll.u32 %s1526_s28, 7 }
  0x32   : > { %s1065_s19 = sshll.u32 %s1426_s16, 11  ;;  %p1854_p9 = scmp.ge.s32.totalorder %s1430_s17, 1 }
  0x33   : > { %s1584_s29 = scalar_lea.hbm %s1844_s1, %s1065_s19  ;;  %s197_s30 = scalar_lea.vmem [#allocation6], %s1035_s18 }
  0x34   : > { %p1577_p11 = pnand %p1854_p9, %p212_p12  ;;  %s204_s4 = sshll.u32 %s197_s30, 4  ;;  %s1586_s4 = int_to_ptr.vmem [resolvable:$true] %s204_s4 }
  0x35   : > { %s194_s6 = scalar_lea.sflag [#allocation7], %s1526_s28  ;;  %s1314_s8 = scalar_lea.hbm %s1584_s29, 2048 }
  0x36   : > { %p1315_p1 = scmp.ne.s32.totalorder %s1584_s29, %s1314_s8  ;;  %s1319_s7 = scalar_lea.hbm %s1844_s1, 4096 }
  0x37   : > { %p1320_p2 = scmp.lt.u32.totalorder %s1584_s29, %s1844_s1  ;;  %p1321_p5 = scmp.lt.u32.totalorder %s1319_s7, %s1314_s8 }
  0x38   : > { %p1317_p6 = pnand %p1315_p1, %p1286_p3  ;;  %p1323_p7 = scmp.lt.u32.totalorder %s1314_s8, %s1584_s29 }
  0x39   : > { %p1322_p4 = por %p1321_p5, %p1320_p2 }
  0x3a   : > { %p1318_p13 = pneg %p1317_p6 }
  0x3b   : > { %p1324_p10 = por %p1323_p7, %p1322_p4 }
  0x3d   : > { %p1325_p12 = pnand %p1324_p10, %p1318_p13 }
  0x3f   : > { %1328 = shalt.err (!%p1325_p12)
}
  0x40   : > { %s1329_s18 = scalar_lea.vmem %s1586_s4, 2048  ;;  %s1435_s22 = smov [#allocation6]  }
  0x41   : > { %p1330_p9 = scmp.ne.s32.totalorder %s1586_s4, %s1329_s18  ;;  %s1334_s23 = sshll.u32 %s1435_s22, 4  ;;  %s1335_s23 = int_to_ptr.vmem [resolvable:$false] %s1334_s23 }
  0x42   : > { %s1336_s30 = scalar_lea.vmem %s1335_s23, 4096  ;;  %p1337_p8 = scmp.lt.s32.totalorder %s1586_s4, %s1335_s23 }
  0x43   : > { %p1332_p1 = pnand %p1330_p9, %p1286_p3  ;;  %p1338_p2 = scmp.lt.s32.totalorder %s1336_s30, %s1329_s18 }
  0x45   : > { %p1333_p6 = pneg %p1332_p1  ;;  %p1339_p5 = por %p1338_p2, %p1337_p8 }
  0x47   : > { %p1340_p4 = pnand %p1339_p5, %p1333_p6 }
  0x49   : > { %1343 = shalt.err (!%p1340_p4)
}
  0x4a   : > { %s1436_s8 = smov 64   ;;  %s1437_s10 = smov 4  }
  0x4b   : > { %1207 = dma.hbm_to_vmem [thread:$0]  (!%p1539_p0), %s1584_s29, 2048, %s1586_s4, %s194_s6, %s1436_s8, %s1436_s8, %s1437_s10  }
  0x4c   : > { %216 = sbr.rel (%p1577_p11) target bundleno = 410 (0x19a), region = 32  ;;  %s1617_s5 = sand.u32 (!%p1577_p11), 1, %s1414_s13  }
  0x4d   : > { %s1039_s7 = sshll.u32 (!%p1577_p11), %s1617_s5, 9  ;;  %s219_s11 = scalar_lea.sflag (!%p1577_p11), [#allocation4], %s1617_s5 }
  0x4e   : > { %s1621_s19 = scalar_lea.vmem (!%p1577_p11), [#allocation3], %s1039_s7  ;;  %p1856_p8 = scmp.ne.s32.totalorder (!%p1577_p11), %s1850_s24, 0 }
  0x53   : > { %1397 = dma.done.wait (%p1856_p8), %s219_s11, 8192  }
  0x54   : > { %1399 = vsyncadd (%p1856_p8), %s219_s11, 4294959104  ;;  %s1040_s28 = sshll.u32 %s1617_s5, 7  ;;  %s228_s9 = scalar_lea.sflag [#allocation7], %s1617_s5 }
  0x55   : > { %s1629_s21 = scalar_lea.vmem [#allocation6], %s1040_s28 }
  0x56   : > { %1401 = dma.done.wait (%p1856_p8), %s228_s9, 2048  }
  0x57   : > { %1403 = vsyncadd (%p1856_p8), %s228_s9, 4294965248  ;;  %v1268_v0 = vld [vmem:[%s1629_s21 + $0x40] sm:$0xff]   ;;  %v1270_v2 = vld [vmem:[%s1629_s21 + $0x48] sm:$0xff]   ;;  %s1041_s24 = sshll.u32 %s1617_s5, 8  ;;  %s1066_s18 = sshll.u32 %s1422_s15, 12 }
  0x58   : > { %v1269_v1 = vld [vmem:[%s1629_s21] sm:$0xff]   ;;  %1067 = vmatprep.subr.bf16.mxu0 %v1268_v0  ;;  %1179 = vmatprep.subr.bf16.mxu1 %v1268_v0  ;;  %v1271_v3 = vld [vmem:[%s1629_s21 + $0x8] sm:$0xff]   ;;  %v1272_v4 = vld [vmem:[%s1629_s21 + $0x50] sm:$0xff]   ;;  %s1723_s6 = scalar_lea.vmem [#allocation8], %s1041_s24  ;;  %s1786_s8 = scalar_lea.hbm %s1846_s3, %s1066_s18 }
  0x59   : > { %1068 = vmatpush3.bf16.msra.mxu0 %v1269_v1  ;;  %1187 = vmatpush3.bf16.msra.mxu1 %v1269_v1  ;;  %v1273_v5 = vld [vmem:[%s1629_s21 + $0x10] sm:$0xff]   ;;  %v1274_v6 = vld [vmem:[%s1629_s21 + $0x58] sm:$0xff]   ;;  %v1276_v8 = vld [vmem:[%s1629_s21 + $0x60] sm:$0xff]   ;;  %s911_s22 = sshll.u32 %s1723_s6, 4  ;;  %s896_s15 = scalar_lea.sflag [#allocation5], %s1617_s5  ;;  %s1788_s22 = int_to_ptr.vmem [resolvable:$true] %s911_s22 }
  0x5a   : > { %1069 = vmatprep.subr.bf16.mxu0 %v1270_v2  ;;  %1180 = vmatprep.subr.bf16.mxu1 %v1270_v2  ;;  %v1275_v7 = vld [vmem:[%s1629_s21 + $0x18] sm:$0xff]   ;;  %v1277_v9 = vld [vmem:[%s1629_s21 + $0x20] sm:$0xff]   ;;  %v1278_v10 = vld [vmem:[%s1629_s21 + $0x68] sm:$0xff]   ;;  %s1344_s10 = scalar_lea.vmem %s1788_s22, 4096  ;;  %p1857_p3 = scmp.ne.s32.totalorder %s1851_s25, 0 }
  0x5b   : > { %v264_v11 = vld [vmem:[%s1621_s19 + $0x8] sm:$0xff]  ;;  %v266_v12 = vld [vmem:[%s1621_s19 + $0x18] sm:$0xff]  ;;  %v1280_v18 = vld [vmem:[%s1629_s21 + $0x70] sm:$0xff]   ;;  %p1345_p0 = scmp.ne.s32.totalorder %s1788_s22, %s1344_s10  ;;  %s1438_s7 = smov [#allocation8]  }
  0x5c   : > { %v296_v13 = vld [vmem:[%s1621_s19 + $0x108] sm:$0xff]  ;;  %v328_v14 = vpack.c.bf16 %v266_v12, %v264_v11  ;;  %v298_v15 = vld [vmem:[%s1621_s19 + $0x118] sm:$0xff]  ;;  %v1281_v19 = vld [vmem:[%s1629_s21 + $0x30] sm:$0xff]   ;;  %s1348_s11 = sshll.u32 %s1438_s7, 4  ;;  %s1349_s11 = int_to_ptr.vmem [resolvable:$false] %s1348_s11 }
  0x5d   : > { %1070 = vmatpush3.bf16.msra.mxu0 %v1271_v3  ;;  %1188 = vmatpush3.bf16.msra.mxu1 %v1271_v3  ;;  %v344_v16 = vpack.c.bf16 %v298_v15, %v296_v13  ;;  %v1279_v17 = vld [vmem:[%s1629_s21 + $0x28] sm:$0xff]   ;;  %v1282_v20 = vld [vmem:[%s1629_s21 + $0x78] sm:$0xff]   ;;  %v263_v22 = vld [vmem:[%s1621_s19] sm:$0xff]  ;;  %p1346_p11 = pnand %p1345_p0, %p1857_p3  ;;  %p1351_p7 = scmp.lt.s32.totalorder %s1788_s22, %s1349_s11 }
  0x5e   : > { %1071 = vmatprep.subr.bf16.mxu0 %v1272_v4  ;;  %1181 = vmatprep.subr.bf16.mxu1 %v1272_v4  ;;  %v1283_v21 = vld [vmem:[%s1629_s21 + $0x38] sm:$0xff]   ;;  %v265_v23 = vld [vmem:[%s1621_s19 + $0x10] sm:$0xff]  ;;  %v295_v24 = vld [vmem:[%s1621_s19 + $0x100] sm:$0xff] }
  0x5f   : > { %524 = vmatprep.mubr.bf16.mxu0 %v328_v14  ;;  %588 = vmatprep.mubr.bf16.mxu1 %v344_v16  ;;  %v297_v25 = vld [vmem:[%s1621_s19 + $0x110] sm:$0xff]  ;;  %v268_v26 = vld [vmem:[%s1621_s19 + $0x28] sm:$0xff]  ;;  %v270_v27 = vld [vmem:[%s1621_s19 + $0x38] sm:$0xff]  ;;  %v327_v30 = vpack.c.bf16 %v265_v23, %v263_v22  ;;  %p1347_p13 = pneg %p1346_p11 }
  0x60   : > { %v300_v28 = vld [vmem:[%s1621_s19 + $0x128] sm:$0xff]  ;;  %v302_v29 = vld [vmem:[%s1621_s19 + $0x138] sm:$0xff]  ;;  %v343_v31 = vpack.c.bf16 %v297_v25, %v295_v24  ;;  %v330_v32 = vpack.c.bf16 %v270_v27, %v268_v26  ;;  %v267_v34 = vld [vmem:[%s1621_s19 + $0x20] sm:$0xff] }
  0x61   : > { %1072 = vmatpush3.bf16.msra.mxu0 %v1273_v5  ;;  %1189 = vmatpush3.bf16.msra.mxu1 %v1273_v5  ;;  %v346_v33 = vpack.c.bf16 %v302_v29, %v300_v28  ;;  %v269_v35 = vld [vmem:[%s1621_s19 + $0x30] sm:$0xff]  ;;  %v299_v36 = vld [vmem:[%s1621_s19 + $0x120] sm:$0xff]  ;;  %v272_v38 = vld [vmem:[%s1621_s19 + $0x48] sm:$0xff] }
  0x62   : > { %1073 = vmatprep.subr.bf16.mxu0 %v1274_v6  ;;  %1182 = vmatprep.subr.bf16.mxu1 %v1274_v6  ;;  %v301_v37 = vld [vmem:[%s1621_s19 + $0x130] sm:$0xff]  ;;  %v274_v39 = vld [vmem:[%s1621_s19 + $0x58] sm:$0xff]  ;;  %v304_v40 = vld [vmem:[%s1621_s19 + $0x148] sm:$0xff]  ;;  %v329_v42 = vpack.c.bf16 %v269_v35, %v267_v34 }
  0x63   : > { %v306_v41 = vld [vmem:[%s1621_s19 + $0x158] sm:$0xff]  ;;  %v345_v43 = vpack.c.bf16 %v301_v37, %v299_v36  ;;  %v332_v44 = vpack.c.bf16 %v274_v39, %v272_v38  ;;  %v271_v46 = vld [vmem:[%s1621_s19 + $0x40] sm:$0xff]  ;;  %v273_v47 = vld [vmem:[%s1621_s19 + $0x50] sm:$0xff] }
  0x64   : > { %v348_v45 = vpack.c.bf16 %v306_v41, %v304_v40  ;;  %v303_v48 = vld [vmem:[%s1621_s19 + $0x140] sm:$0xff]  ;;  %v305_v49 = vld [vmem:[%s1621_s19 + $0x150] sm:$0xff]  ;;  %v276_v50 = vld [vmem:[%s1621_s19 + $0x68] sm:$0xff]  ;;  %v331_v54 = vpack.c.bf16 %v273_v47, %v271_v46 }
  0x65   : > { %1074 = vmatpush3.bf16.msra.mxu0 %v1275_v7  ;;  %1190 = vmatpush3.bf16.msra.mxu1 %v1275_v7  ;;  %v278_v51 = vld [vmem:[%s1621_s19 + $0x78] sm:$0xff]  ;;  %v308_v52 = vld [vmem:[%s1621_s19 + $0x168] sm:$0xff]  ;;  %v347_v55 = vpack.c.bf16 %v305_v49, %v303_v48  ;;  %v275_v58 = vld [vmem:[%s1621_s19 + $0x60] sm:$0xff] }
  0x66   : > { %1075 = vmatprep.subr.bf16.mxu0 %v1276_v8  ;;  %1183 = vmatprep.subr.bf16.mxu1 %v1276_v8  ;;  %v310_v53 = vld [vmem:[%s1621_s19 + $0x178] sm:$0xff]  ;;  %v334_v56 = vpack.c.bf16 %v278_v51, %v276_v50  ;;  %v277_v59 = vld [vmem:[%s1621_s19 + $0x70] sm:$0xff]  ;;  %v307_v60 = vld [vmem:[%s1621_s19 + $0x160] sm:$0xff] }
  0x67   : > { %v350_v57 = vpack.c.bf16 %v310_v53, %v308_v52  ;;  %v309_v61 = vld [vmem:[%s1621_s19 + $0x170] sm:$0xff]  ;;  %v280_v62 = vld [vmem:[%s1621_s19 + $0x88] sm:$0xff]  ;;  %v282_v63 = vld [vmem:[%s1621_s19 + $0x98] sm:$0xff]  ;;  %v333_v2 = vpack.c.bf16 %v277_v59, %v275_v58 }
  0x68   : > { %v312_v0 = vld [vmem:[%s1621_s19 + $0x188] sm:$0xff]  ;;  %v314_v1 = vld [vmem:[%s1621_s19 + $0x198] sm:$0xff]  ;;  %v349_v3 = vpack.c.bf16 %v309_v61, %v307_v60  ;;  %v336_v4 = vpack.c.bf16 %v282_v63, %v280_v62  ;;  %v279_v6 = vld [vmem:[%s1621_s19 + $0x80] sm:$0xff] }
  0x69   : > { %1076 = vmatpush3.bf16.msra.mxu0 %v1277_v9  ;;  %1191 = vmatpush3.bf16.msra.mxu1 %v1277_v9  ;;  %v352_v5 = vpack.c.bf16 %v314_v1, %v312_v0  ;;  %v281_v7 = vld [vmem:[%s1621_s19 + $0x90] sm:$0xff]  ;;  %v311_v8 = vld [vmem:[%s1621_s19 + $0x180] sm:$0xff]  ;;  %v286_v11 = vld [vmem:[%s1621_s19 + $0xb8] sm:$0xff] }
  0x6a   : > { %1077 = vmatprep.subr.bf16.mxu0 %v1278_v10  ;;  %1184 = vmatprep.subr.bf16.mxu1 %v1278_v10  ;;  %v313_v9 = vld [vmem:[%s1621_s19 + $0x190] sm:$0xff]  ;;  %v284_v10 = vld [vmem:[%s1621_s19 + $0xa8] sm:$0xff]  ;;  %v318_v13 = vld [vmem:[%s1621_s19 + $0x1b8] sm:$0xff]  ;;  %v335_v14 = vpack.c.bf16 %v281_v7, %v279_v6 }
  0x6b   : > { %v316_v12 = vld [vmem:[%s1621_s19 + $0x1a8] sm:$0xff]  ;;  %v351_v15 = vpack.c.bf16 %v313_v9, %v311_v8  ;;  %v338_v16 = vpack.c.bf16 %v286_v11, %v284_v10  ;;  %v290_v23 = vld [vmem:[%s1621_s19 + $0xd8] sm:$0xff]  ;;  %v1719_v51 = vld [vmem:[%s1845_s2] ss:$0 sm:$0xff] }
  0x6c   : > { %v288_v22 = vld [vmem:[%s1621_s19 + $0xc8] sm:$0xff]  ;;  %v322_v25 = vld [vmem:[%s1621_s19 + $0x1d8] sm:$0xff] }
  0x6d   : > { %1078 = vmatpush3.bf16.msra.mxu0 %v1279_v17  ;;  %1192 = vmatpush3.bf16.msra.mxu1 %v1279_v17  ;;  %v354_v17 = vpack.c.bf16 %v318_v13, %v316_v12  ;;  %v320_v24 = vld [vmem:[%s1621_s19 + $0x1c8] sm:$0xff]  ;;  %v340_v28 = vpack.c.bf16 %v290_v23, %v288_v22  ;;  %v294_v35 = vld [vmem:[%s1621_s19 + $0xf8] sm:$0xff] }
  0x6e   : > { %1079 = vmatprep.subr.bf16.mxu0 %v1280_v18  ;;  %1185 = vmatprep.subr.bf16.mxu1 %v1280_v18  ;;  %v283_v18 = vld [vmem:[%s1621_s19 + $0xa0] sm:$0xff]  ;;  %v356_v29 = vpack.c.bf16 %v322_v25, %v320_v24  ;;  %v292_v34 = vld [vmem:[%s1621_s19 + $0xe8] sm:$0xff]  ;;  %v326_v37 = vld [vmem:[%s1621_s19 + $0x1f8] sm:$0xff] }
  0x6f   : > { %v324_v36 = vld [vmem:[%s1621_s19 + $0x1e8] sm:$0xff]  ;;  %v342_v40 = vpack.c.bf16 %v294_v35, %v292_v34 }
  0x70   : > { %v358_v41 = vpack.c.bf16 %v326_v37, %v324_v36 }
  0x71   : > { %1080 = vmatpush3.bf16.msra.mxu0 %v1281_v19  ;;  %1193 = vmatpush3.bf16.msra.mxu1 %v1281_v19  ;;  %v285_v19 = vld [vmem:[%s1621_s19 + $0xb0] sm:$0xff] }
  0x72   : > { %1081 = vmatprep.subr.bf16.mxu0 %v1282_v20  ;;  %1186 = vmatprep.subr.bf16.mxu1 %v1282_v20  ;;  %v315_v20 = vld [vmem:[%s1621_s19 + $0x1a0] sm:$0xff]  ;;  %v337_v26 = vpack.c.bf16 %v285_v19, %v283_v18 }
  0x75   : > { %1082 = vmatpush3.bf16.msra.mxu0 %v1283_v21  ;;  %1194 = vmatpush3.bf16.msra.mxu1 %v1283_v21  ;;  %v317_v21 = vld [vmem:[%s1621_s19 + $0x1b0] sm:$0xff] }
  0x76   : > { %v353_v27 = vpack.c.bf16 %v317_v21, %v315_v20 }
  0x78   : > { %525 = vmatmul.mubr.bf16.vlgmr.msra.gmra.mrb[0].mxu0 %v327_v30  ;;  %589 = vmatmul.mubr.bf16.vlgmr.msra.gmra.mrb[0].mxu1 %v343_v31  ;;  %v287_v30 = vld [vmem:[%s1621_s19 + $0xc0] sm:$0xff]  ;;  %v289_v31 = vld [vmem:[%s1621_s19 + $0xd0] sm:$0xff] }
  0x79   : > { %532 = vmatprep.mubr.bf16.mxu0 %v330_v32  ;;  %596 = vmatprep.mubr.bf16.mxu1 %v346_v33  ;;  %v319_v32 = vld [vmem:[%s1621_s19 + $0x1c0] sm:$0xff]  ;;  %v321_v33 = vld [vmem:[%s1621_s19 + $0x1d0] sm:$0xff]  ;;  %v339_v38 = vpack.c.bf16 %v289_v31, %v287_v30 }
  0x7a   : > { %v355_v39 = vpack.c.bf16 %v321_v33, %v319_v32 }
  0x80   : > { %533 = vmatmul.mubr.bf16.gmra.mrb[4].mxu0 %v329_v42  ;;  %597 = vmatmul.mubr.bf16.gmra.mrb[4].mxu1 %v345_v43  ;;  %v291_v42 = vld [vmem:[%s1621_s19 + $0xe0] sm:$0xff]  ;;  %v293_v43 = vld [vmem:[%s1621_s19 + $0xf0] sm:$0xff] }
  0x81   : > { %540 = vmatprep.mubr.bf16.mxu0 %v332_v44  ;;  %604 = vmatprep.mubr.bf16.mxu1 %v348_v45  ;;  %v323_v44 = vld [vmem:[%s1621_s19 + $0x1e0] sm:$0xff]  ;;  %v325_v45 = vld [vmem:[%s1621_s19 + $0x1f0] sm:$0xff]  ;;  %v341_v46 = vpack.c.bf16 %v293_v43, %v291_v42  ;;  %s1350_s19 = scalar_lea.vmem %s1349_s11, 8192 }
  0x82   : > { %v357_v47 = vpack.c.bf16 %v325_v45, %v323_v44  ;;  %p1352_p10 = scmp.lt.s32.totalorder %s1350_s19, %s1344_s10 }
  0x84   : > { %p1353_p12 = por %p1352_p10, %p1351_p7 }
  0x86   : > { %p1354_p9 = pnand %p1353_p12, %p1347_p13 }
  0x88   : > { %541 = vmatmul.mubr.bf16.gmra.mrb[8].mxu0 %v331_v54  ;;  %605 = vmatmul.mubr.bf16.gmra.mrb[8].mxu1 %v347_v55 }
  0x89   : > { %548 = vmatprep.mubr.bf16.mxu0 %v334_v56  ;;  %612 = vmatprep.mubr.bf16.mxu1 %v350_v57 }
  0x90   : > { %549 = vmatmul.mubr.bf16.gmra.mrb[12].mxu0 %v333_v2  ;;  %613 = vmatmul.mubr.bf16.gmra.mrb[12].mxu1 %v349_v3 }
  0x91   : > { %556 = vmatprep.mubr.bf16.mxu0 %v336_v4  ;;  %620 = vmatprep.mubr.bf16.mxu1 %v352_v5 }
  0x98   : > { %557 = vmatmul.mubr.bf16.gmra.mrb[16].mxu0 %v335_v14  ;;  %621 = vmatmul.mubr.bf16.gmra.mrb[16].mxu1 %v351_v15 }
  0x99   : > { %564 = vmatprep.mubr.bf16.mxu0 %v338_v16  ;;  %628 = vmatprep.mubr.bf16.mxu1 %v354_v17 }
  0xa0   : > { %565 = vmatmul.mubr.bf16.gmra.mrb[20].mxu0 %v337_v26  ;;  %629 = vmatmul.mubr.bf16.gmra.mrb[20].mxu1 %v353_v27 }
  0xa1   : > { %572 = vmatprep.mubr.bf16.mxu0 %v340_v28  ;;  %636 = vmatprep.mubr.bf16.mxu1 %v356_v29 }
  0xa8   : > { %573 = vmatmul.mubr.bf16.gmra.mrb[24].mxu0 %v339_v38  ;;  %637 = vmatmul.mubr.bf16.gmra.mrb[24].mxu1 %v355_v39 }
  0xa9   : > { %580 = vmatprep.mubr.bf16.mxu0 %v342_v40  ;;  %644 = vmatprep.mubr.bf16.mxu1 %v358_v41 }
  0xb0   : > { %581 = vmatmul.mubr.bf16.gmra.mrb[28].mxu0 %v341_v46  ;;  %645 = vmatmul.mubr.bf16.gmra.mrb[28].mxu1 %v357_v47 }
 0x14b   : > { %v1083_v48 = vpop.f32.mrb[0].mxu0  ;;  %v1131_v49 = vpop.f32.mrb[0].mxu1 }
 0x14c   : > { %v1084_v50 = vpop.f32.mrb[1].mxu0  ;;  %v1132_v52 = vpop.f32.mrb[1].mxu1 }
 0x14d   : > { %v1085_v53 = vadd.f32 %v1084_v50, %v1083_v48  ;;  %v1133_v54 = vadd.f32 %v1132_v52, %v1131_v49  ;;  %v1086_v55 = vpop.f32.mrb[2].mxu0  ;;  %v1134_v56 = vpop.f32.mrb[2].mxu1 }
 0x14e   : > { %v1087_v57 = vpop.f32.mrb[3].mxu0  ;;  %v1135_v58 = vpop.f32.mrb[3].mxu1 }
 0x14f   : > { %v831_v59 = vadd.f32 %v1085_v53, %v1719_v51  ;;  %v847_v60 = vadd.f32 %v1133_v54, %v1719_v51  ;;  %v1088_v61 = vadd.f32 %v1087_v57, %v1086_v55  ;;  %v1136_v62 = vadd.f32 %v1135_v58, %v1134_v56 }
 0x151   : > { %863 = vst [vmem:[%s1723_s6] sm:$0xff] %v831_v59  ;;  %879 = vst [vmem:[%s1723_s6 + $0x80] sm:$0xff] %v847_v60  ;;  %v832_v63 = vadd.f32 %v1088_v61, %v1719_v51  ;;  %v848_v0 = vadd.f32 %v1136_v62, %v1719_v51 }
 0x153   : > { %864 = vst [vmem:[%s1723_s6 + $0x8] sm:$0xff] %v832_v63  ;;  %880 = vst [vmem:[%s1723_s6 + $0x88] sm:$0xff] %v848_v0  ;;  %v1089_v1 = vpop.f32.mrb[4].mxu0  ;;  %v1137_v2 = vpop.f32.mrb[4].mxu1 }
 0x154   : > { %v1090_v3 = vpop.f32.mrb[5].mxu0  ;;  %v1138_v4 = vpop.f32.mrb[5].mxu1 }
 0x155   : > { %v1091_v5 = vadd.f32 %v1090_v3, %v1089_v1  ;;  %v1139_v6 = vadd.f32 %v1138_v4, %v1137_v2  ;;  %v1092_v7 = vpop.f32.mrb[6].mxu0  ;;  %v1140_v8 = vpop.f32.mrb[6].mxu1 }
 0x156   : > { %v1093_v9 = vpop.f32.mrb[7].mxu0  ;;  %v1141_v10 = vpop.f32.mrb[7].mxu1 }
 0x157   : > { %v833_v11 = vadd.f32 %v1091_v5, %v1719_v51  ;;  %v849_v12 = vadd.f32 %v1139_v6, %v1719_v51  ;;  %v1094_v13 = vadd.f32 %v1093_v9, %v1092_v7  ;;  %v1142_v14 = vadd.f32 %v1141_v10, %v1140_v8 }
 0x159   : > { %865 = vst [vmem:[%s1723_s6 + $0x10] sm:$0xff] %v833_v11  ;;  %881 = vst [vmem:[%s1723_s6 + $0x90] sm:$0xff] %v849_v12  ;;  %v834_v15 = vadd.f32 %v1094_v13, %v1719_v51  ;;  %v850_v16 = vadd.f32 %v1142_v14, %v1719_v51 }
 0x15b   : > { %866 = vst [vmem:[%s1723_s6 + $0x18] sm:$0xff] %v834_v15  ;;  %882 = vst [vmem:[%s1723_s6 + $0x98] sm:$0xff] %v850_v16  ;;  %v1095_v17 = vpop.f32.mrb[8].mxu0  ;;  %v1143_v18 = vpop.f32.mrb[8].mxu1 }
 0x15c   : > { %v1096_v19 = vpop.f32.mrb[9].mxu0  ;;  %v1144_v20 = vpop.f32.mrb[9].mxu1 }
 0x15d   : > { %v1097_v21 = vadd.f32 %v1096_v19, %v1095_v17  ;;  %v1145_v22 = vadd.f32 %v1144_v20, %v1143_v18  ;;  %v1098_v23 = vpop.f32.mrb[10].mxu0  ;;  %v1146_v24 = vpop.f32.mrb[10].mxu1 }
 0x15e   : > { %v1099_v25 = vpop.f32.mrb[11].mxu0  ;;  %v1147_v26 = vpop.f32.mrb[11].mxu1 }
 0x15f   : > { %v835_v27 = vadd.f32 %v1097_v21, %v1719_v51  ;;  %v851_v28 = vadd.f32 %v1145_v22, %v1719_v51  ;;  %v1100_v29 = vadd.f32 %v1099_v25, %v1098_v23  ;;  %v1148_v30 = vadd.f32 %v1147_v26, %v1146_v24 }
 0x161   : > { %867 = vst [vmem:[%s1723_s6 + $0x20] sm:$0xff] %v835_v27  ;;  %883 = vst [vmem:[%s1723_s6 + $0xa0] sm:$0xff] %v851_v28  ;;  %v836_v31 = vadd.f32 %v1100_v29, %v1719_v51  ;;  %v852_v32 = vadd.f32 %v1148_v30, %v1719_v51 }
 0x163   : > { %868 = vst [vmem:[%s1723_s6 + $0x28] sm:$0xff] %v836_v31  ;;  %884 = vst [vmem:[%s1723_s6 + $0xa8] sm:$0xff] %v852_v32  ;;  %v1101_v33 = vpop.f32.mrb[12].mxu0  ;;  %v1149_v34 = vpop.f32.mrb[12].mxu1 }
 0x164   : > { %v1102_v35 = vpop.f32.mrb[13].mxu0  ;;  %v1150_v36 = vpop.f32.mrb[13].mxu1 }
 0x165   : > { %v1103_v37 = vadd.f32 %v1102_v35, %v1101_v33  ;;  %v1151_v38 = vadd.f32 %v1150_v36, %v1149_v34  ;;  %v1104_v39 = vpop.f32.mrb[14].mxu0  ;;  %v1152_v40 = vpop.f32.mrb[14].mxu1 }
 0x166   : > { %v1105_v41 = vpop.f32.mrb[15].mxu0  ;;  %v1153_v42 = vpop.f32.mrb[15].mxu1 }
 0x167   : > { %v837_v43 = vadd.f32 %v1103_v37, %v1719_v51  ;;  %v853_v44 = vadd.f32 %v1151_v38, %v1719_v51  ;;  %v1106_v45 = vadd.f32 %v1105_v41, %v1104_v39  ;;  %v1154_v46 = vadd.f32 %v1153_v42, %v1152_v40 }
 0x169   : > { %869 = vst [vmem:[%s1723_s6 + $0x30] sm:$0xff] %v837_v43  ;;  %885 = vst [vmem:[%s1723_s6 + $0xb0] sm:$0xff] %v853_v44  ;;  %v838_v47 = vadd.f32 %v1106_v45, %v1719_v51  ;;  %v854_v48 = vadd.f32 %v1154_v46, %v1719_v51 }
 0x16b   : > { %870 = vst [vmem:[%s1723_s6 + $0x38] sm:$0xff] %v838_v47  ;;  %886 = vst [vmem:[%s1723_s6 + $0xb8] sm:$0xff] %v854_v48  ;;  %v1107_v49 = vpop.f32.mrb[16].mxu0  ;;  %v1155_v50 = vpop.f32.mrb[16].mxu1 }
 0x16c   : > { %v1108_v52 = vpop.f32.mrb[17].mxu0  ;;  %v1156_v53 = vpop.f32.mrb[17].mxu1 }
 0x16d   : > { %v1109_v54 = vadd.f32 %v1108_v52, %v1107_v49  ;;  %v1157_v55 = vadd.f32 %v1156_v53, %v1155_v50  ;;  %v1110_v56 = vpop.f32.mrb[18].mxu0  ;;  %v1158_v57 = vpop.f32.mrb[18].mxu1 }
 0x16e   : > { %v1111_v58 = vpop.f32.mrb[19].mxu0  ;;  %v1159_v59 = vpop.f32.mrb[19].mxu1 }
 0x16f   : > { %v839_v60 = vadd.f32 %v1109_v54, %v1719_v51  ;;  %v855_v61 = vadd.f32 %v1157_v55, %v1719_v51  ;;  %v1112_v62 = vadd.f32 %v1111_v58, %v1110_v56  ;;  %v1160_v63 = vadd.f32 %v1159_v59, %v1158_v57 }
 0x171   : > { %871 = vst [vmem:[%s1723_s6 + $0x40] sm:$0xff] %v839_v60  ;;  %887 = vst [vmem:[%s1723_s6 + $0xc0] sm:$0xff] %v855_v61  ;;  %v840_v0 = vadd.f32 %v1112_v62, %v1719_v51  ;;  %v856_v1 = vadd.f32 %v1160_v63, %v1719_v51 }
 0x173   : > { %872 = vst [vmem:[%s1723_s6 + $0x48] sm:$0xff] %v840_v0  ;;  %888 = vst [vmem:[%s1723_s6 + $0xc8] sm:$0xff] %v856_v1  ;;  %v1113_v2 = vpop.f32.mrb[20].mxu0  ;;  %v1161_v3 = vpop.f32.mrb[20].mxu1 }
 0x174   : > { %v1114_v4 = vpop.f32.mrb[21].mxu0  ;;  %v1162_v5 = vpop.f32.mrb[21].mxu1 }
 0x175   : > { %v1115_v6 = vadd.f32 %v1114_v4, %v1113_v2  ;;  %v1163_v7 = vadd.f32 %v1162_v5, %v1161_v3  ;;  %v1116_v8 = vpop.f32.mrb[22].mxu0  ;;  %v1164_v9 = vpop.f32.mrb[22].mxu1 }
 0x176   : > { %v1117_v10 = vpop.f32.mrb[23].mxu0  ;;  %v1165_v11 = vpop.f32.mrb[23].mxu1 }
 0x177   : > { %v841_v12 = vadd.f32 %v1115_v6, %v1719_v51  ;;  %v857_v13 = vadd.f32 %v1163_v7, %v1719_v51  ;;  %v1118_v14 = vadd.f32 %v1117_v10, %v1116_v8  ;;  %v1166_v15 = vadd.f32 %v1165_v11, %v1164_v9 }
 0x179   : > { %873 = vst [vmem:[%s1723_s6 + $0x50] sm:$0xff] %v841_v12  ;;  %889 = vst [vmem:[%s1723_s6 + $0xd0] sm:$0xff] %v857_v13  ;;  %v842_v16 = vadd.f32 %v1118_v14, %v1719_v51  ;;  %v858_v17 = vadd.f32 %v1166_v15, %v1719_v51 }
 0x17b   : > { %874 = vst [vmem:[%s1723_s6 + $0x58] sm:$0xff] %v842_v16  ;;  %890 = vst [vmem:[%s1723_s6 + $0xd8] sm:$0xff] %v858_v17  ;;  %v1119_v18 = vpop.f32.mrb[24].mxu0  ;;  %v1167_v19 = vpop.f32.mrb[24].mxu1 }
 0x17c   : > { %v1120_v20 = vpop.f32.mrb[25].mxu0  ;;  %v1168_v21 = vpop.f32.mrb[25].mxu1 }
 0x17d   : > { %v1121_v22 = vadd.f32 %v1120_v20, %v1119_v18  ;;  %v1169_v23 = vadd.f32 %v1168_v21, %v1167_v19  ;;  %v1122_v24 = vpop.f32.mrb[26].mxu0  ;;  %v1170_v25 = vpop.f32.mrb[26].mxu1 }
 0x17e   : > { %v1123_v26 = vpop.f32.mrb[27].mxu0  ;;  %v1171_v27 = vpop.f32.mrb[27].mxu1 }
 0x17f   : > { %v843_v28 = vadd.f32 %v1121_v22, %v1719_v51  ;;  %v859_v29 = vadd.f32 %v1169_v23, %v1719_v51  ;;  %v1124_v30 = vadd.f32 %v1123_v26, %v1122_v24  ;;  %v1172_v31 = vadd.f32 %v1171_v27, %v1170_v25 }
 0x181   : > { %875 = vst [vmem:[%s1723_s6 + $0x60] sm:$0xff] %v843_v28  ;;  %891 = vst [vmem:[%s1723_s6 + $0xe0] sm:$0xff] %v859_v29  ;;  %v844_v32 = vadd.f32 %v1124_v30, %v1719_v51  ;;  %v860_v33 = vadd.f32 %v1172_v31, %v1719_v51 }
 0x183   : > { %876 = vst [vmem:[%s1723_s6 + $0x68] sm:$0xff] %v844_v32  ;;  %892 = vst [vmem:[%s1723_s6 + $0xe8] sm:$0xff] %v860_v33  ;;  %v1125_v34 = vpop.f32.mrb[28].mxu0  ;;  %v1173_v35 = vpop.f32.mrb[28].mxu1 }
 0x184   : > { %v1126_v36 = vpop.f32.mrb[29].mxu0  ;;  %v1174_v37 = vpop.f32.mrb[29].mxu1 }
 0x185   : > { %v1127_v38 = vadd.f32 %v1126_v36, %v1125_v34  ;;  %v1175_v39 = vadd.f32 %v1174_v37, %v1173_v35  ;;  %v1128_v40 = vpop.f32.mrb[30].mxu0  ;;  %v1176_v41 = vpop.f32.mrb[30].mxu1 }
 0x186   : > { %v1129_v42 = vpop.f32.mrb[31].mxu0  ;;  %v1177_v43 = vpop.f32.mrb[31].mxu1 }
 0x187   : > { %v845_v44 = vadd.f32 %v1127_v38, %v1719_v51  ;;  %v861_v45 = vadd.f32 %v1175_v39, %v1719_v51  ;;  %v1130_v46 = vadd.f32 %v1129_v42, %v1128_v40  ;;  %v1178_v47 = vadd.f32 %v1177_v43, %v1176_v41 }
 0x189   : > { %877 = vst [vmem:[%s1723_s6 + $0x70] sm:$0xff] %v845_v44  ;;  %893 = vst [vmem:[%s1723_s6 + $0xf0] sm:$0xff] %v861_v45  ;;  %v846_v48 = vadd.f32 %v1130_v46, %v1719_v51  ;;  %v862_v49 = vadd.f32 %v1178_v47, %v1719_v51 }
 0x18b   : > { %878 = vst [vmem:[%s1723_s6 + $0x78] sm:$0xff] %v846_v48  ;;  %894 = vst [vmem:[%s1723_s6 + $0xf8] sm:$0xff] %v862_v49 }
 0x18c   : > { %1357 = shalt.err (!%p1354_p9)
}
 0x18d   : > { %s1358_s28 = scalar_lea.hbm %s1786_s8, 4096  ;;  %s1362_s24 = scalar_lea.hbm %s1846_s3, 8192 }
 0x18e   : > { %p1359_p1 = scmp.ne.s32.totalorder %s1786_s8, %s1358_s28  ;;  %p1363_p5 = scmp.lt.u32.totalorder %s1786_s8, %s1846_s3 }
 0x18f   : > { %p1364_p4 = scmp.lt.u32.totalorder %s1362_s24, %s1358_s28  ;;  %p1366_p0 = scmp.lt.u32.totalorder %s1358_s28, %s1786_s8 }
 0x190   : > { %p1360_p6 = pnand %p1359_p1, %p1857_p3 }
 0x191   : > { %p1365_p8 = por %p1364_p4, %p1363_p5 }
 0x192   : > { %p1361_p2 = pneg %p1360_p6 }
 0x193   : > { %p1367_p11 = por %p1366_p0, %p1365_p8 }
 0x195   : > { %p1368_p13 = pnand %p1367_p11, %p1361_p2 }
 0x197   : > { %1371 = shalt.err (!%p1368_p13)
}
 0x198   : > { %s1439_s6 = smov 128   ;;  %s1440_s18 = smov 8  }
 0x199   : > { %1199 = dma.vmem_to_hbm [thread:$0]  (%p1857_p3), %s1788_s22, 4096, %s1786_s8, %s896_s15, %s1439_s6, %s1439_s6, %s1440_s18  }
 0x19a PF: > { %s926_s23 = sand.u32 1, %s1410_s12   ;;  %p1858_p7 = scmp.ne.s32.totalorder %s1852_s27, 0 }
 0x19b   : > { %p1859_p10 = scmp.ge.s32.totalorder %s1430_s17, 2  ;;  %s927_s30 = scalar_lea.sflag [#allocation5], %s926_s23 }
 0x19d   : > { %p1209_p12 = pnand %p1859_p10, %p1858_p7 }
 0x19f   : > { %1405 = dma.done.wait (!%p1209_p12), %s927_s30, 4096  }
 0x1a0   : > { %1407 = vsyncadd (!%p1209_p12), %s927_s30, 4294963200  ;;  %s22_s17 = sadd.s32 1, %s1430_s17   ;;  %s1860_s12 = smov %s1414_s13 }
 0x1a1   : > { %p19_p9 = scmp.ge.s32.totalorder %s22_s17, 4   ;;  %s1861_s13 = smov %s1418_s14 }
 0x1a2   : > { %s1862_s14 = smov %s1517_s26  ;;  %s1863_s15 = smov %s1426_s16 }
 0x1a3   : > { %s1864_s16 = smov %s1866_s20  ;;  %21 = sbr.rel (!%p19_p9) target bundleno = 8 (0x8), region = 103 }
 0x1aa   :  { %932 = vsyncpa [#allocation4], 1 }
 0x1ab   :  { %934 = vsyncpa [#allocation4 + $0x1], 1 }
 0x1ac   :  { %935 = vsyncpa [#allocation7], 1 }
 0x1ad   :  { %937 = vsyncpa [#allocation7 + $0x1], 1 }
 0x1ae   :  { %938 = vsyncpa [#allocation5], 1 }
 0x1af   :  { %940 = vsyncpa [#allocation5 + $0x1], 1 }

</bundles_post_ra>
